<compile_context>
chip_gen: v5e
topology: v5e:2x2
jax: 0.10.0
libtpu: 0.0.40
codegen_flags: <defaults>
</compile_context>

<pallas_src>
import functools

import jax
import jax.numpy as jnp
from jax.experimental import pallas as pl
from jax.experimental.pallas import tpu as pltpu


# ---------------------------------------------------------------------------
# Pallas kernels: ChannelGate = sigmoid(MLP(avgpool) + MLP(maxpool)) * x
# Layout inside the kernels: (C, HW_tile)  ->  C on sublanes, HW on lanes.
# ---------------------------------------------------------------------------

def _channel_gate_reduce_kernel(x_ref, w1_ref, b1_ref, w2_ref, b2_ref,
                                scale_ref, sum_acc, max_acc, *, hw_total):
    """Pass 1: accumulate spatial sum/max, finalize MLP + sigmoid -> scale.

    x_ref    : (1, C, THW)   input tile (native layout, HW on lanes)
    w1_ref   : (Ch, C)       first Linear weight (torch layout)
    b1_ref   : (Ch, 1)
    w2_ref   : (C, Ch)       second Linear weight (torch layout)
    b2_ref   : (C, 1)
    scale_ref: (1, C, 1)     per-channel sigmoid gate (output)
    sum_acc  : (C, 1) f32    running spatial sum
    max_acc  : (C, 1) f32    running spatial max
    """
    t = pl.program_id(1)

    @pl.when(t == 0)
    def _():
        sum_acc[...] = jnp.zeros_like(sum_acc)
        max_acc[...] = jnp.full_like(max_acc, -jnp.inf)

    x = x_ref[0, :, :].astype(jnp.float32)                     # (C, THW)
    sum_acc[...] += jnp.sum(x, axis=-1, keepdims=True)         # lane reduce
    max_acc[...] = jnp.maximum(max_acc[...],
                               jnp.max(x, axis=-1, keepdims=True))

    @pl.when(t == pl.num_programs(1) - 1)
    def _():
        avg = sum_acc[...] * (1.0 / float(hw_total))            # (C, 1) exact mean
        mx = max_acc[...]                                       # (C, 1)

        def mlp(p):  # p: (C, 1) column; y = W2 @ relu(W1 @ p + b1) + b2
            h = jnp.dot(w1_ref[...], p, preferred_element_type=jnp.float32)
            h = jnp.maximum(h + b1_ref[...], 0.0)               # (Ch, 1)
            return jnp.dot(w2_ref[...], h,
                           preferred_element_type=jnp.float32) + b2_ref[...]

        att = mlp(avg) + mlp(mx)                                # (C, 1)
        scale_ref[0, :, :] = jax.nn.sigmoid(att).astype(scale_ref.dtype)


def _channel_gate_apply_kernel(x_ref, scale_ref, o_ref):
    """Pass 2: o = x * scale (per-channel column broadcast along lanes)."""
    x = x_ref[0, :, :]                                          # (C, THW)
    s = scale_ref[0, :, :].astype(x.dtype)                      # (C, 1)
    o_ref[0, :, :] = x * s


def _pick_hw_tile(hw, cap=2048):
    """Largest multiple-of-128 divisor of hw (capped); fallback: whole hw."""
    for cand in (cap, 1024, 512, 256, 128):
        if cand <= hw and hw % cand == 0:
            return cand
    return hw


def cbam_channel_only(x_nchw, gate_params):
    """ChannelGate forward. x_nchw: (B, C, H, W) f32 -> (B, C, H, W)."""
    w1 = gate_params["w1"]   # (Ch, C)  torch Linear(C, Ch).weight
    b1 = gate_params["b1"]   # (Ch,)
    w2 = gate_params["w2"]   # (C, Ch)  torch Linear(Ch, C).weight
    b2 = gate_params["b2"]   # (C,)

    B, C, H, W = x_nchw.shape
    HW = H * W
    Ch = w1.shape[0]

    x = x_nchw.reshape(B, C, HW)          # native layout, no transpose
    b1c = b1.reshape(Ch, 1)
    b2c = b2.reshape(C, 1)

    thw = _pick_hw_tile(HW)
    n_t = HW // thw

    # Pass 1: streaming reduction over HW tiles -> per-channel scale.
    scale = pl.pallas_call(
        functools.partial(_channel_gate_reduce_kernel, hw_total=HW),
        out_shape=jax.ShapeDtypeStruct((B, C, 1), jnp.float32),
        grid_spec=pltpu.PrefetchScalarGridSpec(
            num_scalar_prefetch=0,
            grid=(B, n_t),
            in_specs=[
                pl.BlockSpec((1, C, thw), lambda b, t: (b, 0, t)),
                pl.BlockSpec((Ch, C), lambda b, t: (0, 0)),
                pl.BlockSpec((Ch, 1), lambda b, t: (0, 0)),
                pl.BlockSpec((C, Ch), lambda b, t: (0, 0)),
                pl.BlockSpec((C, 1), lambda b, t: (0, 0)),
            ],
            out_specs=pl.BlockSpec((1, C, 1), lambda b, t: (b, 0, 0)),
            scratch_shapes=[pltpu.VMEM((C, 1), jnp.float32),
                            pltpu.VMEM((C, 1), jnp.float32)],
        ),
        compiler_params=pltpu.CompilerParams(
            dimension_semantics=("parallel", "arbitrary")),
    )(x, w1, b1c, w2, b2c)

    # Pass 2: stream x again and apply the gate (lane-dense stores).
    out = pl.pallas_call(
        _channel_gate_apply_kernel,
        out_shape=jax.ShapeDtypeStruct((B, C, HW), x.dtype),
        grid_spec=pltpu.PrefetchScalarGridSpec(
            num_scalar_prefetch=0,
            grid=(B, n_t),
            in_specs=[
                pl.BlockSpec((1, C, thw), lambda b, t: (b, 0, t)),
                pl.BlockSpec((1, C, 1), lambda b, t: (b, 0, 0)),
            ],
            out_specs=pl.BlockSpec((1, C, thw), lambda b, t: (b, 0, t)),
        ),
        compiler_params=pltpu.CompilerParams(
            dimension_semantics=("parallel", "parallel")),
    )(x, scale)

    return out.reshape(B, C, H, W)


# ---------------------------------------------------------------------------
# Pure-JAX reference for the channel gate (matches the PyTorch forward).
# ---------------------------------------------------------------------------

def _channel_gate_ref(x, gate_params):
    w1, b1 = gate_params["w1"], gate_params["b1"]
    w2, b2 = gate_params["w2"], gate_params["b2"]
    avg = jnp.mean(x, axis=(2, 3))                              # (B, C)
    mx = jnp.max(x, axis=(2, 3))                                # (B, C)

    def mlp(v):
        h = jnp.maximum(v @ w1.T + b1, 0.0)
        return h @ w2.T + b2

    att = mlp(avg) + mlp(mx)
    scale = jax.nn.sigmoid(att)[:, :, None, None]
    return x * scale


# ---------------------------------------------------------------------------
# Encoder forward (convs and glue in plain JAX; channel attention pluggable).
# ---------------------------------------------------------------------------

def _conv2d(x, w, b, padding):
    out = jax.lax.conv_general_dilated(
        x, w, window_strides=(1, 1),
        padding=((padding, padding), (padding, padding)),
        dimension_numbers=("NCHW", "OIHW", "NCHW"))
    return out + b[None, :, None, None]


def _triple(x, pa, pb, pc):
    x1 = jax.nn.relu(_conv2d(x, pa["w"], pa["b"], 1))           # k3, p1
    x2 = jax.nn.relu(_conv2d(x, pb["w"], pb["b"], 1))           # k4, p1
    x2 = jnp.pad(x2, ((0, 0), (0, 0), (0, 1), (0, 1)))          # F.pad(0,1,0,1)
    x3 = jax.nn.relu(_conv2d(x, pc["w"], pc["b"], 2))           # k5, p2
    return jnp.concatenate([x1, x2, x3], axis=1)                # -> 65 channels


def _encoder_forward(params, input_S, input_C, gate_fn):
    c = params["convs"]
    g = params["gates"]
    x4 = _triple(input_S, c[0], c[1], c[2])
    x4 = gate_fn(x4, g[0])
    x4 = _triple(x4, c[3], c[4], c[5])
    x4 = gate_fn(x4, g[1])
    x4 = jnp.concatenate([input_C, x4], axis=1)                 # 3 + 65 = 68
    x4 = _triple(x4, c[6], c[7], c[8])
    x4 = gate_fn(x4, g[2])
    x4 = _triple(x4, c[9], c[10], c[11])
    x4 = gate_fn(x4, g[3])
    x4 = _triple(x4, c[12], c[13], c[14])
    x4 = gate_fn(x4, g[4])
    x4 = _triple(x4, c[15], c[16], c[17])
    x4 = gate_fn(x4, g[5])
    x4 = _triple(x4, c[18], c[19], c[20])
    x4 = gate_fn(x4, g[6])
    return jnp.tanh(_conv2d(x4, c[21]["w"], c[21]["b"], 1))


@jax.jit
def encoder_forward_pallas(params, input_S, input_C):
    return _encoder_forward(params, input_S, input_C, cbam_channel_only)


@jax.jit
def encoder_forward_ref(params, input_S, input_C):
    return _encoder_forward(params, input_S, input_C, _channel_gate_ref)


def _init_params(key):
    conv_defs = [
        (3, 50, 3), (3, 10, 4), (3, 5, 5),       # conv1..3
        (65, 50, 3), (65, 10, 4), (65, 5, 5),    # conv4..6
        (68, 50, 3), (68, 10, 4), (68, 5, 5),    # conv7..9
        (65, 50, 3), (65, 10, 4), (65, 5, 5),    # conv10..12
        (65, 50, 3), (65, 10, 4), (65, 5, 5),    # conv13..15
        (65, 50, 3), (65, 10, 4), (65, 5, 5),    # conv16..18
        (65, 50, 3), (65, 10, 4), (65, 5, 5),    # conv19..21
        (65, 3, 3),                               # conv22
    ]
    convs = []
    for cin, cout, k in conv_defs:
        key, kw, kb = jax.random.split(key, 3)
        scale = (2.0 / (cin * k * k)) ** 0.5
        convs.append({
            "w": jax.random.normal(kw, (cout, cin, k, k), jnp.float32) * scale,
            "b": jax.random.normal(kb, (cout,), jnp.float32) * 0.01,
        })
    gates = []
    C, Ch = 65, 65 // 16                         # reduction_ratio=16 -> Ch=4
    for _ in range(7):
        key, k1, k2, k3, k4 = jax.random.split(key, 5)
        gates.append({
            "w1": jax.random.normal(k1, (Ch, C), jnp.float32) * (1.0 / C) ** 0.5,
            "b1": jax.random.normal(k2, (Ch,), jnp.float32) * 0.01,
            "w2": jax.random.normal(k3, (C, Ch), jnp.float32) * (1.0 / Ch) ** 0.5,
            "b2": jax.random.normal(k4, (C,), jnp.float32) * 0.01,
        })
    return {"convs": convs, "gates": gates}


if __name__ == "__main__":
    key = jax.random.PRNGKey(0)
    key, ks, kc, kt = jax.random.split(key, 4)

    B, H, W = 2, 16, 16
    input_S = jax.random.normal(ks, (B, 3, H, W), jnp.float32)
    input_C = jax.random.normal(kc, (B, 3, H, W), jnp.float32)
    params = _init_params(key)

    # Standalone check: Pallas channel gate vs pure-JAX reference.
    xg = jax.random.normal(kt, (B, 65, H, W), jnp.float32)
    got = jax.block_until_ready(cbam_channel_only(xg, params["gates"][0]))
    want = _channel_gate_ref(xg, params["gates"][0])
    assert got.shape == xg.shape
    assert jnp.allclose(got, want, atol=1e-5, rtol=1e-4), "channel gate mismatch"

    # Full Encoder forward with Pallas channel attention vs pure-JAX reference.
    out = jax.block_until_ready(encoder_forward_pallas(params, input_S, input_C))
    ref = encoder_forward_ref(params, input_S, input_C)
    assert out.shape == (B, 3, H, W)
    assert jnp.allclose(out, ref, atol=2e-4, rtol=2e-4), "encoder mismatch vs reference"

    print("KERNEL_OK")
</pallas_src>

<mosaic_0001>
module attributes {stable_mosaic.version = 11 : i64} {
  func.func @_channel_gate_reduce_kernel(%arg0: i32, %arg1: i32, %arg2: memref<1x65x256xf32, #tpu.memory_space<vmem>>, %arg3: memref<4x65xf32, #tpu.memory_space<vmem>>, %arg4: memref<4x1xf32, #tpu.memory_space<vmem>>, %arg5: memref<65x4xf32, #tpu.memory_space<vmem>>, %arg6: memref<65x1xf32, #tpu.memory_space<vmem>>, %arg7: memref<1x65x1xf32, #tpu.memory_space<vmem>>, %arg8: memref<65x1xf32, #tpu.memory_space<vmem>>, %arg9: memref<65x1xf32, #tpu.memory_space<vmem>>) attributes {dimension_semantics = [#tpu.dimension_semantics<parallel>, #tpu.dimension_semantics<arbitrary>], iteration_bounds = array<i64: 2, 1>, scalar_prefetch = 0 : i64, scratch_operands = 2 : i64, tpu.core_type = #tpu.core_type<tc>, window_params = [{transform_indices = @transform_0, window_bounds = array<i64: 1, 65, 256>}, {pipeline_mode = #tpu.pipeline_mode<synchronous>, transform_indices = @transform_1, window_bounds = array<i64: 4, 65>}, {pipeline_mode = #tpu.pipeline_mode<synchronous>, transform_indices = @transform_2, window_bounds = array<i64: 4, 1>}, {pipeline_mode = #tpu.pipeline_mode<synchronous>, transform_indices = @transform_3, window_bounds = array<i64: 65, 4>}, {pipeline_mode = #tpu.pipeline_mode<synchronous>, transform_indices = @transform_4, window_bounds = array<i64: 65, 1>}, {transform_indices = @transform_5, window_bounds = array<i64: 1, 65, 1>}]} {
    %c0_i32 = arith.constant 0 : i32
    %0 = arith.cmpi eq, %arg1, %c0_i32 : i32
    %1 = arith.extui %0 : i1 to i32
    %c0_i32_0 = arith.constant 0 : i32
    %2 = arith.cmpi ne, %1, %c0_i32_0 : i32
    scf.if %2 {
      %cst_14 = arith.constant 0.000000e+00 : f32
      %18 = vector.broadcast %cst_14 : f32 to vector<65x1xf32>
      %c0_15 = arith.constant 0 : index
      %c0_16 = arith.constant 0 : index
      %19 = vector.load %arg8[%c0_15, %c0_16] : memref<65x1xf32, #tpu.memory_space<vmem>>, vector<65x1xf32>
      tpu.vector_store %arg8[%c0_15, %c0_16], %18 {strides = array<i32>} : memref<65x1xf32, #tpu.memory_space<vmem>>, vector<65x1xf32>,
      %cst_17 = arith.constant 0xFF800000 : f32
      %20 = vector.broadcast %cst_17 : f32 to vector<65x1xf32>
      %c0_18 = arith.constant 0 : index
      %c0_19 = arith.constant 0 : index
      %21 = vector.load %arg9[%c0_18, %c0_19] : memref<65x1xf32, #tpu.memory_space<vmem>>, vector<65x1xf32>
      tpu.vector_store %arg9[%c0_18, %c0_19], %20 {strides = array<i32>} : memref<65x1xf32, #tpu.memory_space<vmem>>, vector<65x1xf32>,
    } else {
    }
    %c0 = arith.constant 0 : index
    %c0_1 = arith.constant 0 : index
    %c0_2 = arith.constant 0 : index
    %3 = vector.load %arg2[%c0, %c0_1, %c0_2] : memref<1x65x256xf32, #tpu.memory_space<vmem>>, vector<1x65x256xf32>
    %4 = vector.shape_cast %3 : vector<1x65x256xf32> to vector<65x256xf32>
    %c0_3 = arith.constant 0 : index
    %c0_4 = arith.constant 0 : index
    %5 = vector.load %arg8[%c0_3, %c0_4] : memref<65x1xf32, #tpu.memory_space<vmem>>, vector<65x1xf32>
    %cst = arith.constant dense<0.000000e+00> : vector<65xf32>
    %6 = vector.multi_reduction <add>, %4, %cst [1] : vector<65x256xf32> to vector<65xf32>
    %7 = vector.shape_cast %6 : vector<65xf32> to vector<65x1xf32>
    %8 = arith.addf %5, %7 : vector<65x1xf32>
    %c0_5 = arith.constant 0 : index
    %c0_6 = arith.constant 0 : index
    %9 = vector.load %arg8[%c0_5, %c0_6] : memref<65x1xf32, #tpu.memory_space<vmem>>, vector<65x1xf32>
    tpu.vector_store %arg8[%c0_5, %c0_6], %8 {strides = array<i32>} : memref<65x1xf32, #tpu.memory_space<vmem>>, vector<65x1xf32>,
    %c0_7 = arith.constant 0 : index
    %c0_8 = arith.constant 0 : index
    %10 = vector.load %arg9[%c0_7, %c0_8] : memref<65x1xf32, #tpu.memory_space<vmem>>, vector<65x1xf32>
    %cst_9 = arith.constant dense<0xFF800000> : vector<65xf32>
    %11 = vector.multi_reduction <maximumf>, %4, %cst_9 [1] : vector<65x256xf32> to vector<65xf32>
    %12 = vector.shape_cast %11 : vector<65xf32> to vector<65x1xf32>
    %13 = arith.maximumf %10, %12 : vector<65x1xf32>
    %c0_10 = arith.constant 0 : index
    %c0_11 = arith.constant 0 : index
    %14 = vector.load %arg9[%c0_10, %c0_11] : memref<65x1xf32, #tpu.memory_space<vmem>>, vector<65x1xf32>
    tpu.vector_store %arg9[%c0_10, %c0_11], %13 {strides = array<i32>} : memref<65x1xf32, #tpu.memory_space<vmem>>, vector<65x1xf32>,
    %c0_i32_12 = arith.constant 0 : i32
    %15 = arith.cmpi eq, %arg1, %c0_i32_12 : i32
    %16 = arith.extui %15 : i1 to i32
    %c0_i32_13 = arith.constant 0 : i32
    %17 = arith.cmpi ne, %16, %c0_i32_13 : i32
    scf.if %17 {
      %c0_14 = arith.constant 0 : index
      %c0_15 = arith.constant 0 : index
      %18 = vector.load %arg8[%c0_14, %c0_15] : memref<65x1xf32, #tpu.memory_space<vmem>>, vector<65x1xf32>
      %cst_16 = arith.constant 3.906250e-03 : f32
      %19 = vector.broadcast %cst_16 : f32 to vector<65x1xf32>
      %20 = arith.mulf %18, %19 : vector<65x1xf32>
      %c0_17 = arith.constant 0 : index
      %c0_18 = arith.constant 0 : index
      %21 = vector.load %arg9[%c0_17, %c0_18] : memref<65x1xf32, #tpu.memory_space<vmem>>, vector<65x1xf32>
      %c0_19 = arith.constant 0 : index
      %c0_20 = arith.constant 0 : index
      %22 = vector.load %arg3[%c0_19, %c0_20] : memref<4x65xf32, #tpu.memory_space<vmem>>, vector<4x65xf32>
      %cst_21 = arith.constant dense<0.000000e+00> : vector<4x1xf32>
      %23 = tpu.matmul %22, %20, %cst_21 {dimension_numbers = #tpu.dot_dimension_numbers<[1], [0], [0], [1], [0, 0, 1, 1], [], []>} : vector<4x65xf32>, vector<65x1xf32>, vector<4x1xf32> -> vector<4x1xf32>
      %c0_22 = arith.constant 0 : index
      %c0_23 = arith.constant 0 : index
      %24 = vector.load %arg4[%c0_22, %c0_23] : memref<4x1xf32, #tpu.memory_space<vmem>>, vector<4x1xf32>
      %25 = arith.addf %23, %24 : vector<4x1xf32>
      %cst_24 = arith.constant 0.000000e+00 : f32
      %26 = vector.broadcast %cst_24 : f32 to vector<4x1xf32>
      %27 = arith.maximumf %25, %26 : vector<4x1xf32>
      %c0_25 = arith.constant 0 : index
      %c0_26 = arith.constant 0 : index
      %28 = vector.load %arg5[%c0_25, %c0_26] : memref<65x4xf32, #tpu.memory_space<vmem>>, vector<65x4xf32>
      %cst_27 = arith.constant dense<0.000000e+00> : vector<65x1xf32>
      %29 = tpu.matmul %28, %27, %cst_27 {dimension_numbers = #tpu.dot_dimension_numbers<[1], [0], [0], [1], [0, 0, 1, 1], [], []>} : vector<65x4xf32>, vector<4x1xf32>, vector<65x1xf32> -> vector<65x1xf32>
      %c0_28 = arith.constant 0 : index
      %c0_29 = arith.constant 0 : index
      %30 = vector.load %arg6[%c0_28, %c0_29] : memref<65x1xf32, #tpu.memory_space<vmem>>, vector<65x1xf32>
      %31 = arith.addf %29, %30 : vector<65x1xf32>
      %c0_30 = arith.constant 0 : index
      %c0_31 = arith.constant 0 : index
      %32 = vector.load %arg3[%c0_30, %c0_31] : memref<4x65xf32, #tpu.memory_space<vmem>>, vector<4x65xf32>
      %cst_32 = arith.constant dense<0.000000e+00> : vector<4x1xf32>
      %33 = tpu.matmul %32, %21, %cst_32 {dimension_numbers = #tpu.dot_dimension_numbers<[1], [0], [0], [1], [0, 0, 1, 1], [], []>} : vector<4x65xf32>, vector<65x1xf32>, vector<4x1xf32> -> vector<4x1xf32>
      %c0_33 = arith.constant 0 : index
      %c0_34 = arith.constant 0 : index
      %34 = vector.load %arg4[%c0_33, %c0_34] : memref<4x1xf32, #tpu.memory_space<vmem>>, vector<4x1xf32>
      %35 = arith.addf %33, %34 : vector<4x1xf32>
      %cst_35 = arith.constant 0.000000e+00 : f32
      %36 = vector.broadcast %cst_35 : f32 to vector<4x1xf32>
      %37 = arith.maximumf %35, %36 : vector<4x1xf32>
      %c0_36 = arith.constant 0 : index
      %c0_37 = arith.constant 0 : index
      %38 = vector.load %arg5[%c0_36, %c0_37] : memref<65x4xf32, #tpu.memory_space<vmem>>, vector<65x4xf32>
      %cst_38 = arith.constant dense<0.000000e+00> : vector<65x1xf32>
      %39 = tpu.matmul %38, %37, %cst_38 {dimension_numbers = #tpu.dot_dimension_numbers<[1], [0], [0], [1], [0, 0, 1, 1], [], []>} : vector<65x4xf32>, vector<4x1xf32>, vector<65x1xf32> -> vector<65x1xf32>
      %c0_39 = arith.constant 0 : index
      %c0_40 = arith.constant 0 : index
      %40 = vector.load %arg6[%c0_39, %c0_40] : memref<65x1xf32, #tpu.memory_space<vmem>>, vector<65x1xf32>
      %41 = arith.addf %39, %40 : vector<65x1xf32>
      %42 = arith.addf %31, %41 : vector<65x1xf32>
      %43 = arith.negf %42 : vector<65x1xf32>
      %44 = math.exp %43 : vector<65x1xf32>
      %cst_41 = arith.constant 1.000000e+00 : f32
      %45 = vector.broadcast %cst_41 : f32 to vector<65x1xf32>
      %46 = arith.addf %45, %44 : vector<65x1xf32>
      %47 = arith.divf %45, %46 : vector<65x1xf32>
      %c0_42 = arith.constant 0 : index
      %c0_43 = arith.constant 0 : index
      %c0_44 = arith.constant 0 : index
      %48 = vector.load %arg7[%c0_42, %c0_43, %c0_44] : memref<1x65x1xf32, #tpu.memory_space<vmem>>, vector<1x65x1xf32>
      %49 = vector.shape_cast %48 : vector<1x65x1xf32> to vector<65x1xf32>
      %50 = vector.shape_cast %47 : vector<65x1xf32> to vector<1x65x1xf32>
      tpu.vector_store %arg7[%c0_42, %c0_43, %c0_44], %50 {strides = array<i32>} : memref<1x65x1xf32, #tpu.memory_space<vmem>>, vector<1x65x1xf32>,
    } else {
    }
    return
  }
  func.func @transform_0(%arg0: i32, %arg1: i32) -> (i32, i32, i32) {
    %c0_i32 = arith.constant 0 : i32
    %c0_i32_0 = arith.constant 0 : i32
    return %arg0, %c0_i32, %arg1 : i32, i32, i32
  }
  func.func @transform_1(%arg0: i32, %arg1: i32) -> (i32, i32) {
    %c0_i32 = arith.constant 0 : i32
    %c0_i32_0 = arith.constant 0 : i32
    %c0_i32_1 = arith.constant 0 : i32
    return %c0_i32, %c0_i32_0 : i32, i32
  }
  func.func @transform_2(%arg0: i32, %arg1: i32) -> (i32, i32) {
    %c0_i32 = arith.constant 0 : i32
    %c0_i32_0 = arith.constant 0 : i32
    %c0_i32_1 = arith.constant 0 : i32
    return %c0_i32, %c0_i32_0 : i32, i32
  }
  func.func @transform_3(%arg0: i32, %arg1: i32) -> (i32, i32) {
    %c0_i32 = arith.constant 0 : i32
    %c0_i32_0 = arith.constant 0 : i32
    %c0_i32_1 = arith.constant 0 : i32
    return %c0_i32, %c0_i32_0 : i32, i32
  }
  func.func @transform_4(%arg0: i32, %arg1: i32) -> (i32, i32) {
    %c0_i32 = arith.constant 0 : i32
    %c0_i32_0 = arith.constant 0 : i32
    %c0_i32_1 = arith.constant 0 : i32
    return %c0_i32, %c0_i32_0 : i32, i32
  }
  func.func @transform_5(%arg0: i32, %arg1: i32) -> (i32, i32, i32) {
    %c0_i32 = arith.constant 0 : i32
    %c0_i32_0 = arith.constant 0 : i32
    %c0_i32_1 = arith.constant 0 : i32
    return %arg0, %c0_i32, %c0_i32_0 : i32, i32, i32
  }
}

</mosaic_0001>

<bundles_post_ra>
// kernel: tpu_custom_call.1
= control target key start
LH: loop header
LB: loop body
LE: loop exit
PB: predicated region body
PF: predicated region fallthrough
CT: control target
= control target key end

     0   :  { %s1057_s18 = smov 0   ;;  %s1059_s19 = smov 0   ;;  %s1309_s0 = inlined_call_operand.vmem [shape: f32[2,65,256], index: 0, kind: input, shape index: {}]   ;;  %s1310_s1 = inlined_call_operand.vmem [shape: f32[4,65], index: 1, kind: input, shape index: {}]   ;;  %s1311_s2 = inlined_call_operand.vmem [shape: f32[4,1], index: 2, kind: input, shape index: {}]   ;;  %s1312_s3 = inlined_call_operand.vmem [shape: f32[65,4], index: 3, kind: input, shape index: {}]   ;;  %s1313_s4 = inlined_call_operand.vmem [shape: f32[65,1], index: 4, kind: input, shape index: {}]   ;;  %s1314_s5 = inlined_call_operand.vmem [shape: f32[2,65,1], index: 5, kind: output, shape index: {}]  }
   0x1   :  { %s1061_s20 = smov 0  }
   0x2 LB: > { %s27_s21 = sadd.s32 1, %s1019_s19  ;;  %p897_p0 = scmp.ge.s32.totalorder %s1023_s20, 1  ;;  %s1023_s20 = sphi %s1061_s20, %s15_s20   ;;  %s1019_s19 = sphi %s1059_s19, %s1322_s19   ;;  %s1015_s18 = sphi %s1057_s18, %s1321_s18  }
   0x3   : > { %p29_p1 = scmp.ge.s32.totalorder %s27_s21, 2  ;;  %p206_p2 = scmp.lt.s32.totalorder %s1023_s20, 3 }
   0x5   : > { %s1324_s21 = smov (%p29_p1, %s27_s21), 0  ;;  %p207_p3 = pnand %p897_p0, %p206_p2 }
   0x6   : > { %p239_p4 = scmp.lt.s32.totalorder (!%p207_p3), %s1015_s18, 1 }
   0x7   : > { %210 = sbr.rel (%p207_p3) target bundleno = 522 (0x20a), region = 40 }
   0xc   : > { %s1326_s18 = smov (!%p239_p4, %s1015_s18), 1  ;;  %vm328_vm0 = vcmask 1040384   ;;  %vm257_vm1 = vcmask 7168   ;;  %v1025_v24 = vmov -inf   ;;  %vm266_vm2 = vcmask 0  }
   0xd   : > { %s937_s22 = smul.u32 144, %s1326_s18  ;;  %275 = vst.msk [vmem:[#allocation3 + $0x38] sm:$0xff] %vm257_vm1, %v1025_v24  ;;  %v1026_v41 = vmov 0.0   ;;  %vm442_vm3 = vcmask 531456   ;;  %vm516_vm4 = vcmask 1043456   ;;  %vm488_vm5 = vcmask 31744  }
   0xe   : > { %268 = vst.msk [vmem:[#allocation3] sm:$0xff] %vm257_vm1, %v1025_v24  ;;  %s938_s16 = smul.u32 72, %s1326_s18 }
   0xf   : > { %s1081_s25 = scalar_lea.vmem %s1309_s0, %s937_s22  ;;  %269 = vst.msk [vmem:[#allocation3 + $0x8] sm:$0xff] %vm257_vm1, %v1025_v24 }
  0x10   : > { %v291_v0 = vld [vmem:[%s1081_s25 + $0x70] sm:$0xff]  ;;  %v292_v1 = vld [vmem:[%s1081_s25 + $0x78] sm:$0xff]  ;;  %v289_v2 = vld [vmem:[%s1081_s25 + $0x60] sm:$0xff]  ;;  %270 = vst.msk [vmem:[#allocation3 + $0x10] sm:$0xff] %vm257_vm1, %v1025_v24  ;;  %s1234_s24 = scalar_lea.vmem %s1314_s5, %s938_s16 }
  0x11   : > { %v384_v3 = vmax.f32 %v291_v0, %v292_v1  ;;  %v290_v4 = vld [vmem:[%s1081_s25 + $0x68] sm:$0xff]  ;;  %v285_v5 = vld [vmem:[%s1081_s25 + $0x40] sm:$0xff]  ;;  %v287_v13 = vld [vmem:[%s1081_s25 + $0x50] sm:$0xff]  ;;  %v325_v26 = vadd.f32 %v292_v1, %v291_v0  ;;  %271 = vst.msk [vmem:[#allocation3 + $0x18] sm:$0xff] %vm257_vm1, %v1025_v24 }
  0x12   : > { %v286_v6 = vld [vmem:[%s1081_s25 + $0x48] sm:$0xff]  ;;  %v381_v7 = vmax.f32 %v289_v2, %v290_v4  ;;  %v293_v9 = vld [vmem:[%s1081_s25 + $0x80] sm:$0x1]  ;;  %v288_v14 = vld [vmem:[%s1081_s25 + $0x58] sm:$0xff]  ;;  %272 = vst.msk [vmem:[#allocation3 + $0x20] sm:$0xff] %vm257_vm1, %v1025_v24  ;;  %v322_v30 = vadd.f32 %v290_v4, %v289_v2 }
  0x13   : > { %v375_v8 = vmax.f32 %v285_v5, %v286_v6  ;;  %v294_v10 = vld [vmem:[%s1081_s25 + $0x88] sm:$0x1]  ;;  %385 = vmax.xlane.f32.xlu0 %v384_v3  ;;  %v387_v11 = vsel %vm328_vm0, %v293_v9, -inf  ;;  %v329_v15 = vsel %vm328_vm0, %v293_v9, 0.0  ;;  %v378_v18 = vmax.f32 %v287_v13, %v288_v14  ;;  %v283_v20 = vld [vmem:[%s1081_s25 + $0x30] sm:$0xff]  ;;  %v284_v21 = vld [vmem:[%s1081_s25 + $0x38] sm:$0xff] }
  0x14   : > { %382 = vmax.xlane.f32.xlu1 %v381_v7  ;;  %v388_v12 = vsel %vm328_vm0, %v294_v10, -inf  ;;  %v330_v16 = vsel %vm328_vm0, %v294_v10, 0.0  ;;  %v281_v22 = vld [vmem:[%s1081_s25 + $0x20] sm:$0xff]  ;;  %v282_v23 = vld [vmem:[%s1081_s25 + $0x28] sm:$0xff]  ;;  %v372_v25 = vmax.f32 %v283_v20, %v284_v21  ;;  %273 = vst.msk [vmem:[#allocation3 + $0x28] sm:$0xff] %vm257_vm1, %v1025_v24  ;;  %v279_v28 = vld [vmem:[%s1081_s25 + $0x10] sm:$0xff]  ;;  %v319_v32 = vadd.f32 %v288_v14, %v287_v13 }
  0x15   : > { %376 = vmax.xlane.f32.xlu2 %v375_v8  ;;  %v389_v17 = vmax.f32 %v387_v11, %v388_v12  ;;  %v331_v19 = vadd.f32 %v330_v16, %v329_v15  ;;  %v369_v27 = vmax.f32 %v281_v22, %v282_v23  ;;  %274 = vst.msk [vmem:[#allocation3 + $0x30] sm:$0xff] %vm257_vm1, %v1025_v24  ;;  %v280_v29 = vld [vmem:[%s1081_s25 + $0x18] sm:$0xff]  ;;  %v277_v33 = vld [vmem:[%s1081_s25] sm:$0xff]  ;;  %v278_v34 = vld [vmem:[%s1081_s25 + $0x8] sm:$0xff] }
  0x16   : > { %v366_v31 = vmax.f32 %v279_v28, %v280_v29  ;;  %v363_v35 = vmax.f32 %v277_v33, %v278_v34  ;;  %v316_v36 = vadd.f32 %v286_v6, %v285_v5  ;;  %v313_v37 = vadd.f32 %v284_v21, %v283_v20  ;;  %276 = vst.msk [vmem:[#allocation3 + $0x40] sm:$0x1] %vm266_vm2, %v1025_v24  ;;  %v361_v42 = vld [vmem:[#allocation3 + $0x38] sm:$0xff]  ;;  %v355_v11 = vld [vmem:[#allocation3 + $0x8] sm:$0xff] }
  0x17   : > { %v310_v38 = vadd.f32 %v282_v23, %v281_v22  ;;  %v307_v39 = vadd.f32 %v280_v29, %v279_v28  ;;  %v304_v40 = vadd.f32 %v278_v34, %v277_v33  ;;  %267 = vst.msk [vmem:[#allocation2 + $0x40] sm:$0x1] %vm266_vm2, %v1026_v41  ;;  %v356_v62 = vld [vmem:[#allocation3 + $0x10] sm:$0xff] }
  0x18   : > { %258 = vst.msk [vmem:[#allocation2] sm:$0xff] %vm257_vm1, %v1026_v41  ;;  %v357_v60 = vld [vmem:[#allocation3 + $0x18] sm:$0xff] }
  0x19   : > { %259 = vst.msk [vmem:[#allocation2 + $0x8] sm:$0xff] %vm257_vm1, %v1026_v41  ;;  %v358_v44 = vld [vmem:[#allocation3 + $0x20] sm:$0xff] }
  0x1a   : > { %260 = vst.msk [vmem:[#allocation2 + $0x10] sm:$0xff] %vm257_vm1, %v1026_v41 }
  0x1b   : > { %390 = vmax.xlane.f32.xlu0 %v389_v17  ;;  %261 = vst.msk [vmem:[#allocation2 + $0x18] sm:$0xff] %vm257_vm1, %v1026_v41  ;;  %v359_v52 = vld [vmem:[#allocation3 + $0x28] sm:$0xff] }
  0x1c   : > { %379 = vmax.xlane.f32.xlu1 %v378_v18  ;;  %262 = vst.msk [vmem:[#allocation2 + $0x20] sm:$0xff] %vm257_vm1, %v1026_v41  ;;  %v360_v43 = vld [vmem:[#allocation3 + $0x30] sm:$0xff] }
  0x1d   : > { %332 = vadd.xlane.f32.xlu2 %v331_v19  ;;  %263 = vst.msk [vmem:[#allocation2 + $0x28] sm:$0xff] %vm257_vm1, %v1026_v41  ;;  %v362_v51 = vld [vmem:[#allocation3 + $0x40] sm:$0x1] }
  0x1e   : > { %264 = vst.msk [vmem:[#allocation2 + $0x30] sm:$0xff] %vm257_vm1, %v1026_v41  ;;  %v303_v53 = vld [vmem:[#allocation2 + $0x40] sm:$0x1] }
  0x1f   : > { %265 = vst.msk [vmem:[#allocation2 + $0x38] sm:$0xff] %vm257_vm1, %v1026_v41  ;;  %v295_v41 = vld [vmem:[#allocation2] sm:$0xff] }
  0x23   : > { %373 = vmax.xlane.f32.xlu0 %v372_v25  ;;  %v354_v25 = vld [vmem:[#allocation3] sm:$0xff] }
  0x24   : > { %326 = vadd.xlane.f32.xlu1 %v325_v26  ;;  %v300_v12 = vld [vmem:[#allocation2 + $0x28] sm:$0xff]  ;;  %v299_v26 = vld [vmem:[#allocation2 + $0x20] sm:$0xff] }
  0x25   : > { %370 = vmax.xlane.f32.xlu2 %v369_v27  ;;  %v301_v10 = vld [vmem:[#allocation2 + $0x30] sm:$0xff]  ;;  %v298_v27 = vld [vmem:[#allocation2 + $0x18] sm:$0xff] }
  0x26   : > { %v302_v61 = vld [vmem:[#allocation2 + $0x38] sm:$0xff] }
  0x2b   : > { %323 = vadd.xlane.f32.xlu0 %v322_v30 }
  0x2c   : > { %367 = vmax.xlane.f32.xlu1 %v366_v31 }
  0x2d   : > { %320 = vadd.xlane.f32.xlu2 %v319_v32 }
  0x33   : > { %364 = vmax.xlane.f32.xlu0 %v363_v35 }
  0x34   : > { %317 = vadd.xlane.f32.xlu1 %v316_v36 }
  0x35   : > { %314 = vadd.xlane.f32.xlu2 %v313_v37 }
  0x3b   : > { %311 = vadd.xlane.f32.xlu0 %v310_v38 }
  0x3c   : > { %308 = vadd.xlane.f32.xlu1 %v307_v39  ;;  %v297_v39 = vld [vmem:[#allocation2 + $0x10] sm:$0xff] }
  0x3d   : > { %305 = vadd.xlane.f32.xlu2 %v304_v40  ;;  %v296_v40 = vld [vmem:[#allocation2 + $0x8] sm:$0xff] }
  0x86   : > { %v386_v45 = vpop.xlane.xlu0 %385 }
  0x87   : > { %v399_v46 = vmax.f32 %v361_v42, %v386_v45  ;;  %v383_v47 = vpop.xlane.xlu1 %382 }
  0x88   : > { %v377_v48 = vpop.xlane.xlu2 %376  ;;  %v398_v49 = vmax.f32 %v360_v43, %v383_v47 }
  0x89   : > { %v396_v50 = vmax.f32 %v358_v44, %v377_v48  ;;  %408 = vst.msk [vmem:[#allocation3 + $0x38] sm:$0xff] %vm257_vm1, %v399_v46  ;;  %v440_v46 = vld [vmem:[%s1310_s1] sm:$0xf] }
  0x8a   : > { %407 = vst.msk [vmem:[#allocation3 + $0x30] sm:$0xff] %vm257_vm1, %v398_v49 }
  0x8b   : > { %405 = vst.msk [vmem:[#allocation3 + $0x20] sm:$0xff] %vm257_vm1, %v396_v50 }
  0x8e   : > { %v391_v54 = vpop.xlane.xlu0 %390 }
  0x8f   : > { %v400_v55 = vmax.f32 %v362_v51, %v391_v54  ;;  %v380_v56 = vpop.xlane.xlu1 %379 }
  0x90   : > { %v333_v57 = vpop.xlane.xlu2 %332  ;;  %v397_v58 = vmax.f32 %v359_v52, %v380_v56  ;;  %v438_v6 = vld [vmem:[#allocation3 + $0x38] sm:$0xff] }
  0x91   : > { %v342_v59 = vadd.f32 %v333_v57, %v303_v53  ;;  %409 = vst.msk [vmem:[#allocation3 + $0x40] sm:$0x1] %vm266_vm2, %v400_v55  ;;  %v437_v9 = vld [vmem:[#allocation3 + $0x30] sm:$0xff] }
  0x92   : > { %406 = vst.msk [vmem:[#allocation3 + $0x28] sm:$0xff] %vm257_vm1, %v397_v58  ;;  %v435_v19 = vld [vmem:[#allocation3 + $0x20] sm:$0xff] }
  0x93   : > { %353 = vst.msk [vmem:[#allocation2 + $0x40] sm:$0x1] %vm266_vm2, %v342_v59 }
  0x96   : > { %v374_v63 = vpop.xlane.xlu0 %373 }
  0x97   : > { %v395_v0 = vmax.f32 %v357_v60, %v374_v63  ;;  %v327_v1 = vpop.xlane.xlu1 %326  ;;  %v441_v60 = vld [vmem:[%s1311_s2] sm:$0xf] }
  0x98   : > { %v371_v2 = vpop.xlane.xlu2 %370  ;;  %v341_v3 = vadd.f32 %v327_v1, %v302_v61  ;;  %v439_v4 = vld [vmem:[#allocation3 + $0x40] sm:$0x1]  ;;  %v470_v1 = vld [vmem:[%s1312_s3] sm:$0xff] }
  0x99   : > { %v394_v5 = vmax.f32 %v356_v62, %v371_v2  ;;  %404 = vst.msk [vmem:[#allocation3 + $0x18] sm:$0xff] %vm257_vm1, %v395_v0  ;;  %912 = vmatpush.msk.msra.mxu2 %vm328_vm0, %v439_v4  ;;  %v436_v14 = vld [vmem:[#allocation3 + $0x28] sm:$0xff]  ;;  %v473_v0 = vld [vmem:[%s1312_s3 + $0x18] sm:$0xff] }
  0x9a   : > { %351 = vst.msk [vmem:[#allocation2 + $0x38] sm:$0xff] %vm257_vm1, %v341_v3  ;;  %v421_v7 = vld [vmem:[#allocation2 + $0x40] sm:$0x1] }
  0x9b   : > { %403 = vst.msk [vmem:[#allocation3 + $0x10] sm:$0xff] %vm257_vm1, %v394_v5  ;;  %575 = vmatpush.msra.mxu2 %v438_v6  ;;  %v430_v8 = vmul.f32 0.00390625, %v421_v7  ;;  %v474_v5 = vld [vmem:[%s1312_s3 + $0x20] sm:$0xff]  ;;  %v471_v6 = vld [vmem:[%s1312_s3 + $0x8] sm:$0xff] }
  0x9c   : > { %v475_v7 = vld [vmem:[%s1312_s3 + $0x28] sm:$0xff] }
  0x9d   : > { %576 = vmatpush.msra.mxu2 %v437_v9  ;;  %900 = vmatpush.msk.msra.mxu0 %vm328_vm0, %v430_v8  ;;  %v472_v8 = vld [vmem:[%s1312_s3 + $0x10] sm:$0xff] }
  0x9e   : > { %v324_v13 = vpop.xlane.xlu0 %323  ;;  %v476_v9 = vld [vmem:[%s1312_s3 + $0x30] sm:$0xff] }
  0x9f   : > { %v340_v15 = vadd.f32 %v324_v13, %v301_v10  ;;  %577 = vmatpush.msra.mxu2 %v436_v14  ;;  %v368_v16 = vpop.xlane.xlu1 %367  ;;  %v477_v10 = vld [vmem:[%s1312_s3 + $0x38] sm:$0xff]  ;;  %v479_v13 = vld [vmem:[%s1313_s4] sm:$0xff] }
  0xa0   : > { %v321_v17 = vpop.xlane.xlu2 %320  ;;  %v393_v18 = vmax.f32 %v355_v11, %v368_v16  ;;  %v434_v22 = vld [vmem:[#allocation3 + $0x18] sm:$0xff] }
  0xa1   : > { %v339_v20 = vadd.f32 %v321_v17, %v300_v12  ;;  %350 = vst.msk [vmem:[#allocation2 + $0x30] sm:$0xff] %vm257_vm1, %v340_v15  ;;  %578 = vmatpush.msra.mxu2 %v435_v19  ;;  %v420_v21 = vld [vmem:[#allocation2 + $0x38] sm:$0xff]  ;;  %v478_v11 = vld [vmem:[%s1312_s3 + $0x40] sm:$0x1] }
  0xa2   : > { %402 = vst.msk [vmem:[#allocation3 + $0x8] sm:$0xff] %vm257_vm1, %v393_v18  ;;  %v429_v23 = vmul.f32 0.00390625, %v420_v21  ;;  %v433_v24 = vld [vmem:[#allocation3 + $0x10] sm:$0xff] }
  0xa3   : > { %349 = vst.msk [vmem:[#allocation2 + $0x28] sm:$0xff] %vm257_vm1, %v339_v20  ;;  %579 = vmatpush.msra.mxu2 %v434_v22  ;;  %v482_v12 = vld [vmem:[%s1313_s4 + $0x18] sm:$0xff] }
  0xa4   : > { %457 = vmatpush.msra.mxu0 %v429_v23  ;;  %v483_v23 = vld [vmem:[%s1313_s4 + $0x20] sm:$0xff] }
  0xa5   : > { %580 = vmatpush.msra.mxu2 %v433_v24 }
  0xa6   : > { %v365_v28 = vpop.xlane.xlu0 %364 }
  0xa7   : > { %v392_v29 = vmax.f32 %v354_v25, %v365_v28  ;;  %v318_v30 = vpop.xlane.xlu1 %317 }
  0xa8   : > { %v315_v31 = vpop.xlane.xlu2 %314  ;;  %v338_v32 = vadd.f32 %v318_v30, %v299_v26  ;;  %v419_v34 = vld [vmem:[#allocation2 + $0x30] sm:$0xff]  ;;  %v480_v26 = vld [vmem:[%s1313_s4 + $0x8] sm:$0xff] }
  0xa9   : > { %v337_v33 = vadd.f32 %v315_v31, %v298_v27  ;;  %401 = vst.msk [vmem:[#allocation3] sm:$0xff] %vm257_vm1, %v392_v29  ;;  %v428_v35 = vmul.f32 0.00390625, %v419_v34  ;;  %v432_v36 = vld [vmem:[#allocation3 + $0x8] sm:$0xff] }
  0xaa   : > { %348 = vst.msk [vmem:[#allocation2 + $0x20] sm:$0xff] %vm257_vm1, %v338_v32  ;;  %581 = vmatpush.msra.mxu2 %v432_v36  ;;  %v418_v37 = vld [vmem:[#allocation2 + $0x28] sm:$0xff] }
  0xab   : > { %347 = vst.msk [vmem:[#allocation2 + $0x18] sm:$0xff] %vm257_vm1, %v337_v33  ;;  %458 = vmatpush.msra.mxu0 %v428_v35  ;;  %v427_v38 = vmul.f32 0.00390625, %v418_v37 }
  0xad   : > { %459 = vmatpush.msra.mxu0 %v427_v38 }
  0xae   : > { %v312_v42 = vpop.xlane.xlu0 %311 }
  0xaf   : > { %v336_v43 = vadd.f32 %v312_v42, %v297_v39  ;;  %v309_v44 = vpop.xlane.xlu1 %308 }
  0xb0   : > { %v306_v45 = vpop.xlane.xlu2 %305  ;;  %v335_v47 = vadd.f32 %v309_v44, %v296_v40  ;;  %v431_v48 = vld [vmem:[#allocation3] sm:$0xff] }
  0xb1   : > { %v334_v49 = vadd.f32 %v306_v45, %v295_v41  ;;  %346 = vst.msk [vmem:[#allocation2 + $0x10] sm:$0xff] %vm257_vm1, %v336_v43  ;;  %582 = vmatpush.msra.mxu2 %v431_v48  ;;  %v417_v50 = vld [vmem:[#allocation2 + $0x20] sm:$0xff]  ;;  %v484_v40 = vld [vmem:[%s1313_s4 + $0x28] sm:$0xff]  ;;  %v481_v48 = vld [vmem:[%s1313_s4 + $0x10] sm:$0xff] }
  0xb2   : > { %345 = vst.msk [vmem:[#allocation2 + $0x8] sm:$0xff] %vm257_vm1, %v335_v47  ;;  %913 = vmatmul.msk.f32.vlgmr.msra.gmra.mxu2 %vm442_vm3, %v440_v46  ;;  %v426_v51 = vmul.f32 0.00390625, %v417_v50  ;;  %v416_v52 = vld [vmem:[#allocation2 + $0x18] sm:$0xff] }
  0xb3   : > { %344 = vst.msk [vmem:[#allocation2] sm:$0xff] %vm257_vm1, %v334_v49  ;;  %v425_v53 = vmul.f32 0.00390625, %v416_v52 }
  0xb4   : > { %460 = vmatpush.msra.mxu0 %v426_v51 }
  0xb6   : > { %461 = vmatpush.msra.mxu0 %v425_v53 }
  0xb8   : > { %v415_v54 = vld [vmem:[#allocation2 + $0x10] sm:$0xff] }
  0xb9   : > { %v424_v55 = vmul.f32 0.00390625, %v415_v54  ;;  %v414_v56 = vld [vmem:[#allocation2 + $0x8] sm:$0xff] }
  0xba   : > { %v423_v57 = vmul.f32 0.00390625, %v414_v56  ;;  %v413_v58 = vld [vmem:[#allocation2] sm:$0xff] }
  0xbb   : > { %462 = vmatpush.msra.mxu0 %v424_v55  ;;  %v422_v59 = vmul.f32 0.00390625, %v413_v58 }
  0xbd   : > { %463 = vmatpush.msra.mxu0 %v423_v57 }
  0xbf   : > { %464 = vmatpush.msra.mxu0 %v422_v59 }
  0xc0   : > { %901 = vmatmul.msk.f32.vlgmr.msra.gmra.mxu0 %vm442_vm3, %v440_v46 }
 0x135   : > { %v584_v61 = vpop.f32.mrf.mxu2 }
 0x136   : > { %v585_v62 = vadd.f32 %v584_v61, %v441_v60 }
 0x138   : > { %v587_v63 = vmax.f32 %v585_v62, 0.0 }
 0x13a   : > { %914 = vmatpush.msk.msrb.mxu2 %vm516_vm4, %v587_v63  ;;  %936 = vmatpush.msk.msra.mxu3 %vm516_vm4, %v587_v63 }
 0x13b   : > { %918 = vmatmul.msk.f32.vlgmr.msra.gmra.mxu3 %vm488_vm5, %v473_v0  ;;  %915 = vmatmul.msk.f32.vlgmr.msrb.gmra.mxu2 %vm488_vm5, %v470_v1 }
 0x13d   : > { %v466_v2 = vpop.f32.mrf.mxu0 }
 0x13e   : > { %v467_v3 = vadd.f32 %v466_v2, %v441_v60  ;;  %v485_v60 = vld [vmem:[%s1313_s4 + $0x30] sm:$0xff] }
 0x140   : > { %v469_v4 = vmax.f32 %v467_v3, 0.0 }
 0x142   : > { %902 = vmatpush.msk.msrb.mxu0 %vm516_vm4, %v469_v4  ;;  %935 = vmatpush.msk.msra.mxu1 %vm516_vm4, %v469_v4 }
 0x143   : > { %906 = vmatmul.msk.f32.vlgmr.msra.gmra.mxu1 %vm488_vm5, %v473_v0  ;;  %919 = vmatmul.msk.f32.gmra.mxu3 %vm488_vm5, %v474_v5 }
 0x144   : > { %903 = vmatmul.msk.f32.vlgmr.msrb.gmra.mxu0 %vm488_vm5, %v470_v1  ;;  %916 = vmatmul.msk.f32.gmra.mxu2 %vm488_vm5, %v471_v6 }
 0x14b   : > { %907 = vmatmul.msk.f32.gmra.mxu1 %vm488_vm5, %v474_v5  ;;  %920 = vmatmul.msk.f32.gmra.mxu3 %vm488_vm5, %v475_v7 }
 0x14c   : > { %904 = vmatmul.msk.f32.gmra.mxu0 %vm488_vm5, %v471_v6  ;;  %917 = vmatmul.msk.f32.gmra.mxu2 %vm488_vm5, %v472_v8 }
 0x153   : > { %908 = vmatmul.msk.f32.gmra.mxu1 %vm488_vm5, %v475_v7  ;;  %921 = vmatmul.msk.f32.gmra.mxu3 %vm488_vm5, %v476_v9 }
 0x154   : > { %905 = vmatmul.msk.f32.gmra.mxu0 %vm488_vm5, %v472_v8 }
 0x15b   : > { %909 = vmatmul.msk.f32.gmra.mxu1 %vm488_vm5, %v476_v9  ;;  %922 = vmatmul.msk.f32.gmra.mxu3 %vm488_vm5, %v477_v10 }
 0x163   : > { %910 = vmatmul.msk.f32.gmra.mxu1 %vm488_vm5, %v477_v10  ;;  %923 = vmatmul.msk.f32.gmra.mxu3 %vm488_vm5, %v478_v11 }
 0x16b   : > { %911 = vmatmul.msk.f32.gmra.mxu1 %vm488_vm5, %v478_v11 }
 0x1be   : > { %v617_v14 = vpop.f32.mrf.mxu3  ;;  %v608_v15 = vpop.f32.mrf.mxu2 }
 0x1bf   : > { %v618_v16 = vadd.f32 %v617_v14, %v482_v12  ;;  %v609_v18 = vadd.f32 %v608_v15, %v479_v13 }
 0x1c0   : > { %v546_v17 = vpop.f32.mrf.mxu1 }
 0x1c1   : > { %v547_v19 = vadd.f32 %v546_v17, %v482_v12  ;;  %v537_v20 = vpop.f32.mrf.mxu0 }
 0x1c2   : > { %v538_v21 = vadd.f32 %v537_v20, %v479_v13 }
 0x1c3   : > { %v638_v22 = vadd.f32 %v618_v16, %v547_v19 }
 0x1c4   : > { %v635_v24 = vadd.f32 %v609_v18, %v538_v21  ;;  %v486_v18 = vld [vmem:[%s1313_s4 + $0x38] sm:$0xff] }
 0x1c5   : > { %v927_v25 = vmul.f32 -1.442695, %v638_v22 }
 0x1c6   : > { %v620_v27 = vpop.f32.mrf.mxu3  ;;  %v924_v28 = vmul.f32 -1.442695, %v635_v24 }
 0x1c7   : > { %965 = vpow2.f32 %v927_v25  ;;  %v621_v29 = vadd.f32 %v620_v27, %v483_v23  ;;  %v611_v30 = vpop.f32.mrf.mxu2 }
 0x1c8   : > { %v549_v31 = vpop.f32.mrf.mxu1  ;;  %967 = vpow2.f32 %v924_v28  ;;  %v612_v32 = vadd.f32 %v611_v30, %v480_v26 }
 0x1c9   : > { %v550_v33 = vadd.f32 %v549_v31, %v483_v23  ;;  %v540_v34 = vpop.f32.mrf.mxu0 }
 0x1ca   : > { %v541_v35 = vadd.f32 %v540_v34, %v480_v26 }
 0x1cb   : > { %v639_v36 = vadd.f32 %v621_v29, %v550_v33 }
 0x1cc   : > { %v636_v37 = vadd.f32 %v612_v32, %v541_v35 }
 0x1cd   : > { %v966_v38 = vpop.eup %965  ;;  %v928_v39 = vmul.f32 -1.442695, %v639_v36 }
 0x1ce   : > { %v968_v41 = vpop.eup %967  ;;  %v674_v42 = vadd.f32 1.0, %v966_v38  ;;  %v623_v43 = vpop.f32.mrf.mxu3  ;;  %v925_v44 = vmul.f32 -1.442695, %v636_v37 }
 0x1cf   : > { %969 = vpow2.f32 %v928_v39  ;;  %v671_v45 = vadd.f32 1.0, %v968_v41  ;;  %v624_v47 = vadd.f32 %v623_v43, %v484_v40  ;;  %v614_v49 = vpop.f32.mrf.mxu2 }
 0x1d0   : > { %971 = vrcp.f32 %v674_v42  ;;  %v552_v46 = vpop.f32.mrf.mxu1  ;;  %v615_v53 = vadd.f32 %v614_v49, %v481_v48  ;;  %v734_v0 = vand.u32 2147483647, %v674_v42  ;;  %v736_v3 = vand.u32 2147483648, %v674_v42  ;;  %v487_v49 = vld [vmem:[%s1313_s4 + $0x40] sm:$0x1] }
 0x1d1   : > { %973 = vrcp.f32 %v671_v45  ;;  %v543_v50 = vpop.f32.mrf.mxu0  ;;  %v553_v51 = vadd.f32 %v552_v46, %v484_v40  ;;  %vm685_vm6 = vweird.f32 %v671_v45  ;;  %v689_v4 = vand.u32 2147483647, %v671_v45 }
 0x1d2   : > { %975 = vpow2.f32 %v925_v44  ;;  %v544_v52 = vadd.f32 %v543_v50, %v481_v48  ;;  %v691_v9 = vand.u32 2147483648, %v671_v45  ;;  %vm730_vm9 = vweird.f32 %v674_v42 }
 0x1d3   : > { %v640_v54 = vadd.f32 %v624_v47, %v553_v51  ;;  %vm735_vm11 = vcmp.eq.f32.partialorder %v734_v0, 8.507059e+37  ;;  %v737_v20 = vor.u32 1.1754944e-38, %v736_v3  ;;  %vm690_vm13 = vcmp.eq.f32.partialorder %v689_v4, 8.507059e+37 }
 0x1d4   : > { %v637_v56 = vadd.f32 %v615_v53, %v544_v52  ;;  %v692_v22 = vor.u32 1.1754944e-38, %v691_v9 }
 0x1d5   : > { %v970_v55 = vpop.eup %969  ;;  %v929_v59 = vmul.f32 -1.442695, %v640_v54 }
 0x1d6   : > { %v972_v57 = vpop.eup %971  ;;  %v1214_v58 = vadd.f32 1.0, %v970_v55  ;;  %v626_v61 = vpop.f32.mrf.mxu3  ;;  %v926_v1 = vmul.f32 -1.442695, %v637_v56 }
 0x1d7   : > { %v974_v62 = vpop.eup %973  ;;  %v726_v63 = vmul.f32 %v972_v57, %v674_v42  ;;  %v627_v8 = vadd.f32 %v626_v61, %v485_v60  ;;  %vm731_vm7 = vweird.f32 %v972_v57 }
 0x1d8   : > { %v976_v2 = vpop.eup %975  ;;  %977 = vrcp.f32 %v1214_v58  ;;  %v555_v5 = vpop.f32.mrf.mxu1  ;;  %v681_v7 = vmul.f32 %v974_v62, %v671_v45  ;;  %vm686_vm8 = vweird.f32 %v974_v62  ;;  %vm1224_vm10 = vmor %vm730_vm9, %vm731_vm7  ;;  %vm745_vm14 = vweird.f32 %v1214_v58 }
 0x1d9   : > { %v727_v6 = vsub.f32 1.0, %v726_v63  ;;  %979 = vpow2.f32 %v929_v59  ;;  %v1221_v10 = vadd.f32 1.0, %v976_v2  ;;  %v556_v11 = vadd.f32 %v555_v5, %v485_v60  ;;  %vm1237_vm12 = vmor %vm685_vm6, %vm686_vm8 }
 0x1da   : > { %v682_v13 = vsub.f32 1.0, %v681_v7  ;;  %981 = vpow2.f32 %v926_v1  ;;  %v749_v38 = vand.u32 2147483647, %v1214_v58  ;;  %v751_v39 = vand.u32 2147483648, %v1214_v58 }
 0x1db   : > { %v728_v12 = vmul.f32 %v972_v57, %v727_v6  ;;  %983 = vrcp.f32 %v1221_v10  ;;  %v641_v17 = vadd.f32 %v627_v8, %v556_v11  ;;  %vm700_vm0 = vweird.f32 %v1221_v10 }
 0x1dc   : > { %v683_v16 = vmul.f32 %v974_v62, %v682_v13  ;;  %v706_v43 = vand.u32 2147483648, %v1221_v10  ;;  %v704_v48 = vand.u32 2147483647, %v1221_v10  ;;  %v752_v50 = vor.u32 1.1754944e-38, %v751_v39 }
 0x1dd   : > { %v729_v14 = vadd.f32 %v972_v57, %v728_v12  ;;  %v930_v30 = vmul.f32 -1.442695, %v641_v17  ;;  %vm750_vm5 = vcmp.eq.f32.partialorder %v749_v38, 8.507059e+37 }
 0x1de   : > { %v978_v19 = vpop.eup %977  ;;  %v629_v23 = vpop.f32.mrf.mxu3  ;;  %v684_v27 = vadd.f32 %v974_v62, %v683_v16  ;;  %v707_v59 = vor.u32 1.1754944e-38, %v706_v43  ;;  %vm705_vm7 = vcmp.eq.f32.partialorder %v704_v48, 8.507059e+37 }
 0x1df   : > { %v980_v24 = vpop.eup %979  ;;  %v733_v25 = vsel %vm1224_vm10, %v972_v57, %v729_v14  ;;  %v741_v26 = vmul.f32 %v978_v19, %v1214_v58  ;;  %v630_v32 = vadd.f32 %v629_v23, %v486_v18  ;;  %vm746_vm15 = vweird.f32 %v978_v19 }
 0x1e0   : > { %v738_v28 = vsel %vm735_vm11, %v737_v20, %v733_v25  ;;  %v1244_v29 = vadd.f32 1.0, %v980_v24  ;;  %v558_v31 = vpop.f32.mrf.mxu1  ;;  %v982_v33 = vpop.eup %981  ;;  %v688_v35 = vsel %vm1237_vm12, %v974_v62, %v684_v27  ;;  %vm747_vm4 = vmor %vm745_vm14, %vm746_vm15 }
 0x1e1   : > { %818 = vst.msk [vmem:[%s1234_s24 + $0x18] sm:$0xff] %vm257_vm1, %v738_v28  ;;  %v742_v34 = vsub.f32 1.0, %v741_v26  ;;  %v559_v36 = vadd.f32 %v558_v31, %v486_v18  ;;  %v984_v37 = vpop.eup %983  ;;  %v693_v40 = vsel %vm690_vm13, %v692_v22, %v688_v35  ;;  %v1259_v44 = vadd.f32 1.0, %v982_v33 }
 0x1e2   : > { %985 = vrcp.f32 %v1244_v29  ;;  %815 = vst.msk [vmem:[%s1234_s24] sm:$0xff] %vm257_vm1, %v693_v40  ;;  %v696_v42 = vmul.f32 %v984_v37, %v1221_v10  ;;  %vm701_vm3 = vweird.f32 %v984_v37  ;;  %v766_v0 = vand.u32 2147483648, %v1244_v29 }
 0x1e3   : > { %v743_v41 = vmul.f32 %v978_v19, %v742_v34  ;;  %987 = vpow2.f32 %v930_v30  ;;  %v642_v45 = vadd.f32 %v630_v32, %v559_v36  ;;  %vm1270_vm6 = vmor %vm700_vm0, %vm701_vm3  ;;  %v764_v9 = vand.u32 2147483647, %v1244_v29 }
 0x1e4   : > { %v697_v47 = vsub.f32 1.0, %v696_v42  ;;  %989 = vrcp.f32 %v1259_v44  ;;  %vm760_vm9 = vweird.f32 %v1244_v29  ;;  %v767_v10 = vor.u32 1.1754944e-38, %v766_v0 }
 0x1e5   : > { %v744_v46 = vadd.f32 %v978_v19, %v743_v41  ;;  %v931_v54 = vmul.f32 -1.442695, %v642_v45  ;;  %vm715_vm10 = vweird.f32 %v1259_v44  ;;  %v719_v15 = vand.u32 2147483647, %v1259_v44 }
 0x1e6   : > { %v632_v51 = vpop.f32.mrf.mxu3  ;;  %v698_v53 = vmul.f32 %v984_v37, %v697_v47  ;;  %v721_v16 = vand.u32 2147483648, %v1259_v44  ;;  %vm765_vm13 = vcmp.eq.f32.partialorder %v764_v9, 8.507059e+37 }
 0x1e7   : > { %v748_v52 = vsel %vm747_vm4, %v978_v19, %v744_v46  ;;  %v633_v58 = vadd.f32 %v632_v51, %v487_v49  ;;  %991 = vpow2.f32 %v931_v54  ;;  %vm720_vm15 = vcmp.eq.f32.partialorder %v719_v15, 8.507059e+37 }
 0x1e8   : > { %v986_v55 = vpop.eup %985  ;;  %v753_v56 = vsel %vm750_vm5, %v752_v50, %v748_v52  ;;  %v561_v60 = vpop.f32.mrf.mxu1  ;;  %v699_v62 = vadd.f32 %v984_v37, %v698_v53  ;;  %v722_v23 = vor.u32 1.1754944e-38, %v721_v16 }
 0x1e9   : > { %819 = vst.msk [vmem:[%s1234_s24 + $0x20] sm:$0xff] %vm257_vm1, %v753_v56  ;;  %v756_v61 = vmul.f32 %v986_v55, %v1244_v29  ;;  %v988_v63 = vpop.eup %987  ;;  %v562_v1 = vadd.f32 %v561_v60, %v487_v49  ;;  %vm761_vm8 = vweird.f32 %v986_v55 }
 0x1ea   : > { %v703_v3 = vsel %vm1270_vm6, %v984_v37, %v699_v62  ;;  %v677_v4 = vadd.f32 1.0, %v988_v63  ;;  %v990_v5 = vpop.eup %989  ;;  %vm762_vm11 = vmor %vm760_vm9, %vm761_vm8 }
 0x1eb   : > { %v757_v2 = vsub.f32 1.0, %v756_v61  ;;  %v708_v6 = vsel %vm705_vm7, %v707_v59, %v703_v3  ;;  %v643_v7 = vadd.f32 %v633_v58, %v562_v1  ;;  %v711_v11 = vmul.f32 %v990_v5, %v1259_v44 }
 0x1ec   : > { %816 = vst.msk [vmem:[%s1234_s24 + $0x8] sm:$0xff] %vm257_vm1, %v708_v6  ;;  %993 = vrcp.f32 %v677_v4  ;;  %vm716_vm12 = vweird.f32 %v990_v5  ;;  %v781_v29 = vand.u32 2147483648, %v677_v4  ;;  %v779_v34 = vand.u32 2147483647, %v677_v4 }
 0x1ed   : > { %v758_v8 = vmul.f32 %v986_v55, %v757_v2  ;;  %v932_v12 = vmul.f32 -1.442695, %v643_v7  ;;  %v992_v13 = vpop.eup %991  ;;  %v712_v17 = vsub.f32 1.0, %v711_v11  ;;  %vm717_vm14 = vmor %vm715_vm10, %vm716_vm12  ;;  %vm775_vm3 = vweird.f32 %v677_v4 }
 0x1ee   : > { %v678_v18 = vadd.f32 1.0, %v992_v13  ;;  %v782_v37 = vor.u32 1.1754944e-38, %v781_v29  ;;  %vm780_vm5 = vcmp.eq.f32.partialorder %v779_v34, 8.507059e+37 }
 0x1ef   : > { %v759_v14 = vadd.f32 %v986_v55, %v758_v8  ;;  %995 = vpow2.f32 %v932_v12  ;;  %v713_v21 = vmul.f32 %v990_v5, %v712_v17 }
 0x1f0   : > { %997 = vrcp.f32 %v678_v18  ;;  %v796_v40 = vand.u32 2147483648, %v678_v18  ;;  %v794_v43 = vand.u32 2147483647, %v678_v18  ;;  %vm790_vm7 = vweird.f32 %v678_v18 }
 0x1f1   : > { %v763_v19 = vsel %vm762_vm11, %v986_v55, %v759_v14  ;;  %v714_v25 = vadd.f32 %v990_v5, %v713_v21 }
 0x1f2   : > { %v768_v20 = vsel %vm765_vm13, %v767_v10, %v763_v19  ;;  %v994_v22 = vpop.eup %993  ;;  %v797_v46 = vor.u32 1.1754944e-38, %v796_v40  ;;  %vm795_vm9 = vcmp.eq.f32.partialorder %v794_v43, 8.507059e+37 }
 0x1f3   : > { %820 = vst.msk [vmem:[%s1234_s24 + $0x28] sm:$0xff] %vm257_vm1, %v768_v20  ;;  %v771_v24 = vmul.f32 %v994_v22, %v677_v4  ;;  %v718_v28 = vsel %vm717_vm14, %v990_v5, %v714_v25  ;;  %vm776_vm0 = vweird.f32 %v994_v22 }
 0x1f4   : > { %v723_v30 = vsel %vm720_vm15, %v722_v23, %v718_v28  ;;  %vm777_vm4 = vmor %vm775_vm3, %vm776_vm0 }
 0x1f5   : > { %v996_v26 = vpop.eup %995  ;;  %v772_v27 = vsub.f32 1.0, %v771_v24  ;;  %817 = vst.msk [vmem:[%s1234_s24 + $0x10] sm:$0xff] %vm257_vm1, %v723_v30 }
 0x1f6   : > { %v679_v31 = vadd.f32 1.0, %v996_v26  ;;  %v998_v32 = vpop.eup %997 }
 0x1f7   : > { %v773_v33 = vmul.f32 %v994_v22, %v772_v27  ;;  %v786_v35 = vmul.f32 %v998_v32, %v678_v18  ;;  %vm791_vm6 = vweird.f32 %v998_v32 }
 0x1f8   : > { %999 = vrcp.f32 %v679_v31  ;;  %vm792_vm8 = vmor %vm790_vm7, %vm791_vm6  ;;  %v811_v51 = vand.u32 2147483648, %v679_v31  ;;  %v809_v53 = vand.u32 2147483647, %v679_v31  ;;  %vm805_vm11 = vweird.f32 %v679_v31 }
 0x1f9   : > { %v774_v36 = vadd.f32 %v994_v22, %v773_v33  ;;  %v787_v38 = vsub.f32 1.0, %v786_v35 }
 0x1fa   : > { %v812_v55 = vor.u32 1.1754944e-38, %v811_v51  ;;  %vm810_vm13 = vcmp.eq.f32.partialorder %v809_v53, 8.507059e+37 }
 0x1fb   : > { %v778_v39 = vsel %vm777_vm4, %v994_v22, %v774_v36  ;;  %v788_v42 = vmul.f32 %v998_v32, %v787_v38 }
 0x1fc   : > { %v783_v41 = vsel %vm780_vm5, %v782_v37, %v778_v39 }
 0x1fd   : > { %821 = vst.msk [vmem:[%s1234_s24 + $0x30] sm:$0xff] %vm257_vm1, %v783_v41  ;;  %v789_v45 = vadd.f32 %v998_v32, %v788_v42 }
 0x1fe   : > { %v1000_v44 = vpop.eup %999 }
 0x1ff   : > { %v801_v47 = vmul.f32 %v1000_v44, %v679_v31  ;;  %v793_v48 = vsel %vm792_vm8, %v998_v32, %v789_v45  ;;  %vm806_vm10 = vweird.f32 %v1000_v44 }
 0x200   : > { %v798_v49 = vsel %vm795_vm9, %v797_v46, %v793_v48  ;;  %vm807_vm12 = vmor %vm805_vm11, %vm806_vm10 }
 0x201   : > { %v802_v50 = vsub.f32 1.0, %v801_v47  ;;  %822 = vst.msk [vmem:[%s1234_s24 + $0x38] sm:$0xff] %vm257_vm1, %v798_v49 }
 0x203   : > { %v803_v52 = vmul.f32 %v1000_v44, %v802_v50 }
 0x205   : > { %v804_v54 = vadd.f32 %v1000_v44, %v803_v52 }
 0x207   : > { %v808_v56 = vsel %vm807_vm12, %v1000_v44, %v804_v54 }
 0x208   : > { %v813_v57 = vsel %vm810_vm13, %v812_v55, %v808_v56 }
 0x209   : > { %823 = vst.msk [vmem:[%s1234_s24 + $0x40] sm:$0x1] %vm266_vm2, %v813_v57 }
 0x20a PF: > { %s15_s20 = sadd.s32 1, %s1023_s20   ;;  %s1321_s18 = smov %s1019_s19 }
 0x20b   : > { %p12_p5 = scmp.ge.s32.totalorder %s15_s20, 4   ;;  %s1322_s19 = smov %s1324_s21 }
 0x20d   :  { %14 = sbr.rel (!%p12_p5) target bundleno = 2 (0x2), region = 78 }

</bundles_post_ra>
